<compile_context>
chip_gen: v7x
topology: tpu7x:2x2x1
jax: 0.10.0
libtpu: 0.0.40
codegen_flags: <defaults>
</compile_context>

<pallas_src>
import functools

import jax
import jax.numpy as jnp
import numpy as np
from jax import lax
from jax.experimental import pallas as pl
from jax.experimental.pallas import tpu as pltpu


def _dwsep_fused_kernel(x_ref, w_ref, b_ref, o_ref, xs_ref, *, taps, C, Lp):
    # x_ref : (C, Lp)      one zero-padded image, flattened per channel (lanes)
    # w_ref : (Cout, T*C)  fused depthwise*pointwise weights (final layout)
    # b_ref : (Cout, 1)    fused bias (f32)
    # o_ref : (Cout, Lp)   conv output at every flat position (lane-dense)
    # xs_ref: (T*C, Lp)    VMEM scratch: stacked shifted images
    x = x_ref[...]
    for t, d in enumerate(taps):                       # static, unrolled
        # Shift the flat image by the tap's flat offset d (pure lane rotation,
        # XLU slot).  Wrap-around only touches flat positions the wrapper
        # discards (junk border / stride columns).
        xt = x if d == 0 else pltpu.roll(x, shift=Lp - d, axis=1)
        xs_ref[t * C:(t + 1) * C, :] = xt
    # Single MXU push with contraction depth T*C; accumulate in f32.
    acc = jnp.dot(w_ref[...], xs_ref[...], preferred_element_type=jnp.float32)
    o_ref[...] = (acc + b_ref[...]).astype(o_ref.dtype)


def depthwise_conv2d(x_nchw, w_dw, b_dw, w_pw, b_pw, *, stride, padding):
    """Forward pass of DepthwiseConv2d (PyTorch semantics).

    x_nchw : (N, C, H, W)
    w_dw   : (C, 1, KH, KW)   depthwise conv weight (groups=C)
    b_dw   : (C,)             depthwise conv bias
    w_pw   : (Cout, C, 1, 1)  pointwise conv weight
    b_pw   : (Cout,)          pointwise conv bias
    returns: (N, Cout, H_out, W_out)
    """
    N, C, H, W = x_nchw.shape
    KH, KW = int(w_dw.shape[2]), int(w_dw.shape[3])
    Cout = int(w_pw.shape[0])
    T = KH * KW
    H_out = (H + 2 * padding - KH) // stride + 1
    W_out = (W + 2 * padding - KW) // stride + 1
    Hp, Wp = H + 2 * padding, W + 2 * padding
    L = Hp * Wp
    Lp = ((L + 127) // 128) * 128                      # lane-dense flat length

    in_dtype = x_nchw.dtype

    # ---- layout glue (wrapper / XLA): pad + free reshape, NO transpose -----
    x_pad = jnp.pad(x_nchw, ((0, 0), (0, 0),
                             (padding, padding), (padding, padding)))
    x_flat = x_pad.reshape(N, C, L)                    # contiguous -> bitcast
    if Lp > L:
        x_flat = jnp.pad(x_flat, ((0, 0), (0, 0), (0, Lp - L)))

    # ---- fuse weights & biases (tiny, wrapper-side) ------------------------
    wdw = w_dw[:, 0, :, :].reshape(C, T).astype(jnp.float32)        # (C, T)
    wpw = w_pw[:, :, 0, 0].astype(jnp.float32)                      # (Cout, C)
    # w2d[co, t*C + c] = w_pw[co, c] * w_dw[c, kh, kw]   (t = kh*KW + kw)
    w2d = (wpw[:, None, :] * jnp.transpose(wdw)[None, :, :]
           ).reshape(Cout, T * C).astype(in_dtype)
    # pointwise(depthwise(x) + b_dw) == pointwise(depthwise(x)) + wpw @ b_dw
    b_fused = (b_pw.astype(jnp.float32) + wpw @ b_dw.astype(jnp.float32)
               ).reshape(Cout, 1)

    # Static flat offset of each tap (kh, kw) in the flattened padded image.
    taps = tuple(kh * Wp + kw for kh in range(KH) for kw in range(KW))

    kernel = functools.partial(_dwsep_fused_kernel, taps=taps, C=C, Lp=Lp)

    itemsize = jnp.dtype(in_dtype).itemsize
    cost = pl.CostEstimate(
        flops=2 * N * Cout * T * C * Lp,
        transcendentals=0,
        bytes_accessed=(N * C * Lp * itemsize            # activation in
                        + Cout * T * C * itemsize        # weights
                        + Cout * 4                       # bias
                        + N * Cout * Lp * itemsize))     # activation out

    out_flat = pl.pallas_call(
        kernel,
        out_shape=jax.ShapeDtypeStruct((N, Cout, Lp), in_dtype),
        grid=(N,),                                      # one image per step
        in_specs=[
            pl.BlockSpec((None, C, Lp), lambda n: (n, 0, 0)),
            pl.BlockSpec((Cout, T * C), lambda n: (0, 0)),
            pl.BlockSpec((Cout, 1), lambda n: (0, 0)),
        ],
        out_specs=pl.BlockSpec((None, Cout, Lp), lambda n: (n, 0, 0)),
        scratch_shapes=[pltpu.VMEM((T * C, Lp), in_dtype)],
        compiler_params=pltpu.CompilerParams(
            dimension_semantics=("parallel",)),
        cost_estimate=cost,
    )(x_flat, w2d, b_fused)

    # ---- layout glue: keep valid output positions (junk columns dropped) ---
    y = out_flat[:, :, :L].reshape(N, Cout, Hp, Wp)
    y = y[:, :,
          0:(H_out - 1) * stride + 1:stride,
          0:(W_out - 1) * stride + 1:stride]            # (N, Cout, H_out, W_out)
    return y.astype(in_dtype)


def _reference(x, w_dw, b_dw, w_pw, b_pw, *, stride, padding):
    dn = ("NCHW", "OIHW", "NCHW")
    C = x.shape[1]
    h = lax.conv_general_dilated(
        x, w_dw, window_strides=(stride, stride),
        padding=((padding, padding), (padding, padding)),
        dimension_numbers=dn, feature_group_count=C)
    h = h + b_dw.reshape(1, -1, 1, 1)
    y = lax.conv_general_dilated(
        h, w_pw, window_strides=(1, 1), padding="VALID",
        dimension_numbers=dn)
    return y + b_pw.reshape(1, -1, 1, 1)


if __name__ == "__main__":
    # DepthwiseConv2d(in_channels=4, out_channels=8, kernel_size=3,
    #                 stride=1, padding=1, bias=True)
    N, C, H, W = 2, 4, 16, 16
    Cout, K, stride, padding = 8, 3, 1, 1

    key = jax.random.PRNGKey(0)
    kx, k1, k2, k3, k4 = jax.random.split(key, 5)
    x = jax.random.normal(kx, (N, C, H, W), dtype=jnp.float32)
    w_dw = jax.random.normal(k1, (C, 1, K, K), dtype=jnp.float32) * 0.2
    b_dw = jax.random.normal(k2, (C,), dtype=jnp.float32) * 0.1
    w_pw = jax.random.normal(k3, (Cout, C, 1, 1), dtype=jnp.float32) * 0.2
    b_pw = jax.random.normal(k4, (Cout,), dtype=jnp.float32) * 0.1

    out = depthwise_conv2d(x, w_dw, b_dw, w_pw, b_pw,
                           stride=stride, padding=padding)
    out = jax.block_until_ready(out)

    ref = _reference(x, w_dw, b_dw, w_pw, b_pw, stride=stride, padding=padding)
    ref = jax.block_until_ready(ref)

    assert out.shape == (N, Cout, H, W), out.shape
    np.testing.assert_allclose(np.asarray(out), np.asarray(ref),
                               rtol=1e-4, atol=1e-4)
    print("KERNEL_OK")
</pallas_src>

<mosaic_0001>
module attributes {stable_mosaic.version = 11 : i64} {
  func.func @_dwsep_fused_kernel(%arg0: i32, %arg1: memref<1x4x384xf32, #tpu.memory_space<vmem>>, %arg2: memref<8x36xf32, #tpu.memory_space<vmem>>, %arg3: memref<8x1xf32, #tpu.memory_space<vmem>>, %arg4: memref<1x8x384xf32, #tpu.memory_space<vmem>>, %arg5: memref<36x384xf32, #tpu.memory_space<vmem>>) attributes {dimension_semantics = [#tpu.dimension_semantics<parallel>], iteration_bounds = array<i64: 2>, scalar_prefetch = 0 : i64, scratch_operands = 1 : i64, tpu.core_type = #tpu.core_type<tc>, window_params = [{transform_indices = @transform_0, window_bounds = array<i64: 1, 4, 384>}, {pipeline_mode = #tpu.pipeline_mode<synchronous>, transform_indices = @transform_1, window_bounds = array<i64: 8, 36>}, {pipeline_mode = #tpu.pipeline_mode<synchronous>, transform_indices = @transform_2, window_bounds = array<i64: 8, 1>}, {transform_indices = @transform_3, window_bounds = array<i64: 1, 8, 384>}]} {
    %c0 = arith.constant 0 : index
    %c0_0 = arith.constant 0 : index
    %c0_1 = arith.constant 0 : index
    %0 = vector.load %arg1[%c0, %c0_0, %c0_1] : memref<1x4x384xf32, #tpu.memory_space<vmem>>, vector<1x4x384xf32>
    %1 = vector.shape_cast %0 : vector<1x4x384xf32> to vector<4x384xf32>
    %c0_2 = arith.constant 0 : index
    %c0_3 = arith.constant 0 : index
    %2 = vector.load %arg5[%c0_2, %c0_3] : memref<36x384xf32, #tpu.memory_space<vmem>>, vector<4x384xf32>
    tpu.vector_store %arg5[%c0_2, %c0_3], %1 {strides = array<i32>} : memref<36x384xf32, #tpu.memory_space<vmem>>, vector<4x384xf32>,
    %c383_i32 = arith.constant 383 : i32
    %3 = tpu.dynamic_rotate %1 by %c383_i32 dim 1 : vector<4x384xf32>, i32 -> vector<4x384xf32>
    %c4 = arith.constant 4 : index
    %c0_4 = arith.constant 0 : index
    %4 = vector.load %arg5[%c4, %c0_4] : memref<36x384xf32, #tpu.memory_space<vmem>>, vector<4x384xf32>
    tpu.vector_store %arg5[%c4, %c0_4], %3 {strides = array<i32>} : memref<36x384xf32, #tpu.memory_space<vmem>>, vector<4x384xf32>,
    %c382_i32 = arith.constant 382 : i32
    %5 = tpu.dynamic_rotate %1 by %c382_i32 dim 1 : vector<4x384xf32>, i32 -> vector<4x384xf32>
    %c8 = arith.constant 8 : index
    %c0_5 = arith.constant 0 : index
    %6 = vector.load %arg5[%c8, %c0_5] : memref<36x384xf32, #tpu.memory_space<vmem>>, vector<4x384xf32>
    tpu.vector_store %arg5[%c8, %c0_5], %5 {strides = array<i32>} : memref<36x384xf32, #tpu.memory_space<vmem>>, vector<4x384xf32>,
    %c366_i32 = arith.constant 366 : i32
    %7 = tpu.dynamic_rotate %1 by %c366_i32 dim 1 : vector<4x384xf32>, i32 -> vector<4x384xf32>
    %c12 = arith.constant 12 : index
    %c0_6 = arith.constant 0 : index
    %8 = vector.load %arg5[%c12, %c0_6] : memref<36x384xf32, #tpu.memory_space<vmem>>, vector<4x384xf32>
    tpu.vector_store %arg5[%c12, %c0_6], %7 {strides = array<i32>} : memref<36x384xf32, #tpu.memory_space<vmem>>, vector<4x384xf32>,
    %c365_i32 = arith.constant 365 : i32
    %9 = tpu.dynamic_rotate %1 by %c365_i32 dim 1 : vector<4x384xf32>, i32 -> vector<4x384xf32>
    %c16 = arith.constant 16 : index
    %c0_7 = arith.constant 0 : index
    %10 = vector.load %arg5[%c16, %c0_7] : memref<36x384xf32, #tpu.memory_space<vmem>>, vector<4x384xf32>
    tpu.vector_store %arg5[%c16, %c0_7], %9 {strides = array<i32>} : memref<36x384xf32, #tpu.memory_space<vmem>>, vector<4x384xf32>,
    %c364_i32 = arith.constant 364 : i32
    %11 = tpu.dynamic_rotate %1 by %c364_i32 dim 1 : vector<4x384xf32>, i32 -> vector<4x384xf32>
    %c20 = arith.constant 20 : index
    %c0_8 = arith.constant 0 : index
    %12 = vector.load %arg5[%c20, %c0_8] : memref<36x384xf32, #tpu.memory_space<vmem>>, vector<4x384xf32>
    tpu.vector_store %arg5[%c20, %c0_8], %11 {strides = array<i32>} : memref<36x384xf32, #tpu.memory_space<vmem>>, vector<4x384xf32>,
    %c348_i32 = arith.constant 348 : i32
    %13 = tpu.dynamic_rotate %1 by %c348_i32 dim 1 : vector<4x384xf32>, i32 -> vector<4x384xf32>
    %c24 = arith.constant 24 : index
    %c0_9 = arith.constant 0 : index
    %14 = vector.load %arg5[%c24, %c0_9] : memref<36x384xf32, #tpu.memory_space<vmem>>, vector<4x384xf32>
    tpu.vector_store %arg5[%c24, %c0_9], %13 {strides = array<i32>} : memref<36x384xf32, #tpu.memory_space<vmem>>, vector<4x384xf32>,
    %c347_i32 = arith.constant 347 : i32
    %15 = tpu.dynamic_rotate %1 by %c347_i32 dim 1 : vector<4x384xf32>, i32 -> vector<4x384xf32>
    %c28 = arith.constant 28 : index
    %c0_10 = arith.constant 0 : index
    %16 = vector.load %arg5[%c28, %c0_10] : memref<36x384xf32, #tpu.memory_space<vmem>>, vector<4x384xf32>
    tpu.vector_store %arg5[%c28, %c0_10], %15 {strides = array<i32>} : memref<36x384xf32, #tpu.memory_space<vmem>>, vector<4x384xf32>,
    %c346_i32 = arith.constant 346 : i32
    %17 = tpu.dynamic_rotate %1 by %c346_i32 dim 1 : vector<4x384xf32>, i32 -> vector<4x384xf32>
    %c32 = arith.constant 32 : index
    %c0_11 = arith.constant 0 : index
    %18 = vector.load %arg5[%c32, %c0_11] : memref<36x384xf32, #tpu.memory_space<vmem>>, vector<4x384xf32>
    tpu.vector_store %arg5[%c32, %c0_11], %17 {strides = array<i32>} : memref<36x384xf32, #tpu.memory_space<vmem>>, vector<4x384xf32>,
    %c0_12 = arith.constant 0 : index
    %c0_13 = arith.constant 0 : index
    %19 = vector.load %arg2[%c0_12, %c0_13] : memref<8x36xf32, #tpu.memory_space<vmem>>, vector<8x36xf32>
    %c0_14 = arith.constant 0 : index
    %c0_15 = arith.constant 0 : index
    %20 = vector.load %arg5[%c0_14, %c0_15] : memref<36x384xf32, #tpu.memory_space<vmem>>, vector<36x384xf32>
    %cst = arith.constant dense<0.000000e+00> : vector<8x384xf32>
    %21 = tpu.matmul %19, %20, %cst {dimension_numbers = #tpu.dot_dimension_numbers<[1], [0], [0], [1], [0, 0, 1, 1], [], []>} : vector<8x36xf32>, vector<36x384xf32>, vector<8x384xf32> -> vector<8x384xf32>
    %c0_16 = arith.constant 0 : index
    %c0_17 = arith.constant 0 : index
    %22 = vector.load %arg3[%c0_16, %c0_17] : memref<8x1xf32, #tpu.memory_space<vmem>>, vector<8x1xf32>
    %23 = vector.broadcast %22 : vector<8x1xf32> to vector<8x384xf32>
    %24 = arith.addf %21, %23 : vector<8x384xf32>
    %c0_18 = arith.constant 0 : index
    %c0_19 = arith.constant 0 : index
    %c0_20 = arith.constant 0 : index
    %25 = vector.load %arg4[%c0_18, %c0_19, %c0_20] : memref<1x8x384xf32, #tpu.memory_space<vmem>>, vector<1x8x384xf32>
    %26 = vector.shape_cast %25 : vector<1x8x384xf32> to vector<8x384xf32>
    %27 = vector.shape_cast %24 : vector<8x384xf32> to vector<1x8x384xf32>
    tpu.vector_store %arg4[%c0_18, %c0_19, %c0_20], %27 {strides = array<i32>} : memref<1x8x384xf32, #tpu.memory_space<vmem>>, vector<1x8x384xf32>,
    return
  }
  func.func @transform_0(%arg0: i32) -> (i32, i32, i32) {
    %c0_i32 = arith.constant 0 : i32
    %c0_i32_0 = arith.constant 0 : i32
    %c0_i32_1 = arith.constant 0 : i32
    return %arg0, %c0_i32, %c0_i32_0 : i32, i32, i32
  }
  func.func @transform_1(%arg0: i32) -> (i32, i32) {
    %c0_i32 = arith.constant 0 : i32
    %c0_i32_0 = arith.constant 0 : i32
    %c0_i32_1 = arith.constant 0 : i32
    return %c0_i32, %c0_i32_0 : i32, i32
  }
  func.func @transform_2(%arg0: i32) -> (i32, i32) {
    %c0_i32 = arith.constant 0 : i32
    %c0_i32_0 = arith.constant 0 : i32
    %c0_i32_1 = arith.constant 0 : i32
    return %c0_i32, %c0_i32_0 : i32, i32
  }
  func.func @transform_3(%arg0: i32) -> (i32, i32, i32) {
    %c0_i32 = arith.constant 0 : i32
    %c0_i32_0 = arith.constant 0 : i32
    %c0_i32_1 = arith.constant 0 : i32
    return %arg0, %c0_i32, %c0_i32_0 : i32, i32, i32
  }
}

</mosaic_0001>

<bundles_post_ra>
// kernel: tpu_custom_call.1
= control target key start
LH: loop header
LB: loop body
LE: loop exit
PB: predicated region body
PF: predicated region fallthrough
CT: control target
= control target key end

     0   :  { %8 = vsyncpa [#allocation4], 0  ;;  %s1034_s0 = inlined_call_operand.hbm [shape: f32[2,4,384], index: 0, kind: input, shape index: {}]   ;;  %s1035_s1 = inlined_call_operand.vmem [shape: f32[8,36], index: 1, kind: input, shape index: {}]   ;;  %s1036_s2 = inlined_call_operand.vmem [shape: f32[8,1], index: 2, kind: input, shape index: {}]   ;;  %s1037_s3 = inlined_call_operand.hbm [shape: f32[2,8,384], index: 3, kind: output, shape index: {}]  }
   0x1   :  { %10 = vsyncpa [#allocation4 + $0x1], 0 }
   0x2   :  { %11 = vsyncpa [#allocation5], 0 }
   0x3   :  { %13 = vsyncpa [#allocation5 + $0x1], 0  ;;  %s845_s12 = smov 0   ;;  %s847_s13 = smov 0  }
   0x4   :  { %s849_s14 = smov 0   ;;  %s851_s15 = smov 0  }
   0x5 LB: > { %s866_s16 = sadd.s32 4294967295, %s809_s15   ;;  %s602_s17 = sadd.s32 4294967294, %s809_s15   ;;  %s809_s15 = sphi %s851_s15, %s1051_s15   ;;  %s805_s14 = sphi %s849_s14, %s1050_s14   ;;  %s801_s13 = sphi %s847_s13, %s1049_s13   ;;  %s797_s12 = sphi %s845_s12, %s1048_s12  }
   0x6   : > { %s870_s18 = sadd.s32 1, %s809_s15   ;;  %s26_s19 = sadd.s32 1, %s805_s14 }
   0x7   : > { %s23_s20 = ssub.s32 %s809_s15, %s870_s18  ;;  %p33_p0 = scmp.ne.s32.totalorder %s805_s14, %s801_s13 }
   0x8   : > { %p24_p1 = scmp.eq.s32.totalorder %s23_s20, 0  ;;  %p34_p2 = scmp.eq.s32.totalorder %s809_s15, 0 }
   0x9   : > { %p39_p3 = scmp.ne.s32.totalorder %s801_s13, %s797_s12  ;;  %p40_p4 = scmp.eq.s32.totalorder %s866_s16, 0 }
   0xa   : > { %s882_s21 = scalar_select %p24_p1, %s805_s14, %s26_s19  }
   0xb   : > { %p35_p5 = por %p34_p2, %p33_p0  ;;  %p884_p6 = por %p40_p4, %p39_p3 }
   0xc   : > { %p105_p7 = scmp.eq.s32.totalorder %s866_s16, 1  ;;  %p111_p8 = scmp.eq.s32.totalorder %s602_s17, 1 }
   0xd   : > { %p665_p10 = scmp.lt.s32.totalorder %s809_s15, 2  ;;  %s137_s25 = sand.u32 1, %s805_s14  }
   0xe   : > { %p891_p11 = por %p105_p7, %p33_p0  ;;  %p895_p12 = por %p111_p8, %p39_p3 }
   0xf   : > { %s649_s26 = smul.u32 192, %s809_s15  ;;  %p906_p13 = pnand %p665_p10, %p35_p5 }
  0x10   : > { %s1040_s23 = scalar_select %p891_p11, 1, 0 }
  0x11   : > { %s1041_s24 = scalar_select %p895_p12, 1, 0 }
  0x12   : > { %s648_s27 = smul.u32 12, %s137_s25  ;;  %s904_s30 = scalar_lea.hbm %s1034_s0, %s649_s26 }
  0x13   : > { %s138_s7 = scalar_lea.sflag [#allocation4], %s137_s25  ;;  %s713_s8 = scalar_lea.hbm %s904_s30, 192 }
  0x14   : > { %s141_s5 = scalar_lea.vmem [#allocation3], %s648_s27  ;;  %p714_p2 = scmp.ne.s32.totalorder %s904_s30, %s713_s8 }
  0x15   : > { %s149_s6 = sshll.u32 %s141_s5, 4  ;;  %p715_p3 = pneg %p906_p13  ;;  %s911_s6 = int_to_ptr.vmem [resolvable:$true] %s149_s6 }
  0x16   : > { %s718_s11 = scalar_lea.hbm %s1034_s0, 384  ;;  %p719_p7 = scmp.lt.u32.totalorder %s904_s30, %s1034_s0 }
  0x17   : > { %p716_p4 = pnand %p715_p3, %p714_p2  ;;  %p720_p8 = scmp.lt.u32.totalorder %s718_s11, %s713_s8 }
  0x18   : > { %p722_p9 = scmp.lt.u32.totalorder %s713_s8, %s904_s30 }
  0x19   : > { %p717_p5 = pneg %p716_p4  ;;  %p721_p10 = por %p720_p8, %p719_p7 }
  0x1b   : > { %p723_p0 = por %p722_p9, %p721_p10 }
  0x1d   : > { %p724_p1 = pnand %p723_p0, %p717_p5 }
  0x1f   : > { %727 = shalt.err (!%p724_p1)
}
  0x20   : > { %s728_s20 = scalar_lea.vmem %s911_s6, 192  ;;  %s811_s25 = smov [#allocation3]  }
  0x21   : > { %p729_p2 = scmp.ne.s32.totalorder %s911_s6, %s728_s20  ;;  %s733_s26 = sshll.u32 %s811_s25, 4  ;;  %s734_s26 = int_to_ptr.vmem [resolvable:$false] %s733_s26 }
  0x22   : > { %s735_s27 = scalar_lea.vmem %s734_s26, 384  ;;  %p736_p11 = scmp.lt.s32.totalorder %s911_s6, %s734_s26 }
  0x23   : > { %p731_p4 = pnand %p729_p2, %p715_p3  ;;  %p737_p7 = scmp.lt.s32.totalorder %s735_s27, %s728_s20 }
  0x25   : > { %p732_p12 = pneg %p731_p4  ;;  %p738_p8 = por %p737_p7, %p736_p11 }
  0x27   : > { %p739_p9 = pnand %p738_p8, %p732_p12 }
  0x29   : > { %742 = shalt.err (!%p739_p9)
}
  0x2a   : > { %660 = dma.hbm_to_vmem [thread:$0]  (!%p906_p13), %s904_s30, 192, %s911_s6, %s138_s7  }
  0x2b   : > { %p1043_p0 = scmp.lt.s32.totalorder %s809_s15, 3  ;;  %p1044_p1 = scmp.ge.s32.totalorder %s809_s15, 1 }
  0x2d   : > { %p155_p3 = pnand %p1044_p1, %p1043_p0 }
  0x2e   : > { %s944_s28 = sand.u32 (!%p155_p3), 1, %s801_s13  }
  0x2f   : > { %158 = sbr.rel (%p155_p3) target bundleno = 456 (0x1c8), region = 32  ;;  %s161_s5 = scalar_lea.sflag (!%p155_p3), [#allocation4], %s944_s28 }
  0x30   : > { %s650_s29 = smul.u32 (!%p155_p3), 12, %s944_s28 }
  0x32   : > { %s164_s8 = scalar_lea.vmem (!%p155_p3), [#allocation3], %s650_s29 }
  0x36   : > { %788 = dma.done.wait (%p884_p6), %s161_s5, 192  }
  0x37   : > { %790 = vsyncadd (%p884_p6), %s161_s5, 4294967104  ;;  %v188_v0 = vld [vmem:[%s164_s8 + $0x8] sm:$0xf]  ;;  %v187_v1 = vld [vmem:[%s164_s8] sm:$0xff]  ;;  %s812_s30 = smov 110   ;;  %s813_s4 = smov 127   ;;  %v201_v7 = vlaneseq }
  0x38   : > { %236 = vrot.lane.b32.xlu1 %v188_v0, %s812_s30  ;;  %194 = vst [vmem:[#allocation2 + $0x10] sm:$0xf] %v188_v0  ;;  %199 = vrot.lane.b32.xlu0 %v188_v0, %s813_s4  ;;  %192 = vst [vmem:[#allocation2] sm:$0xf] %v187_v1  ;;  %v190_v2 = vcombine.high %v187_v1, %v187_v1  ;;  %s814_s6 = smov 126   ;;  %v815_v3 = vmov 0.0|0.0  }
  0x39   : > { %642 = vmatprep.subr.bf16.mxu1 %v815_v3  ;;  %s816_s22 = smov 108   ;;  %s817_s7 = smov 91   ;;  %v821_v4 = vmov 0.0   ;;  %vm822_vm0 = vmmov 0   ;;  %v823_v5 = vmov 0   ;;  %v353_v6 = vld [vmem:[%s1036_s2] sm:$0xff] }
  0x3a   : > { %193 = vst [vmem:[#allocation2 + $0x8] sm:$0xf] %v190_v2  ;;  %s818_s9 = smov 109   ;;  %s819_s10 = smov 92   ;;  %437 = vmatprep.mubr.f32.mxu0 %v821_v4  ;;  %631 = vmatprep.mubr.msk.f32.mxu1 %vm822_vm0, %v821_v4  ;;  %v958_v8 = vand.u32 127, %v201_v7  ;;  %vm363_vm9 = vcmask 1043456  }
  0x3b   : > { %s820_s11 = smov 90   ;;  %711 = vset.pattern.permute.xlu0 %v823_v5  ;;  %vm359_vm10 = vcmask 293888   ;;  %s651_s26 = smul.u32 24, %s944_s28 }
  0x3c   : > { %232 = vrot.lane.b32.xlu1 %v187_v1, %s812_s30  ;;  %195 = vrot.lane.b32.xlu0 %v187_v1, %s813_s4  ;;  %vm238_vm1 = vcmp.lt.s32.totalorder %v958_v8, 110  ;;  %vm203_vm2 = vcmp.lt.s32.totalorder %v958_v8, 127  ;;  %vm225_vm3 = vcmp.lt.s32.totalorder %v958_v8, 126  ;;  %vm273_vm4 = vcmp.lt.s32.totalorder %v958_v8, 108  ;;  %s652_s27 = smul.u32 384, %s866_s16  ;;  %s518_s16 = scalar_lea.sflag [#allocation5], %s944_s28 }
  0x3d   : > { %vm308_vm5 = vcmp.lt.s32.totalorder %v958_v8, 91  ;;  %vm260_vm6 = vcmp.lt.s32.totalorder %v958_v8, 109  ;;  %vm295_vm7 = vcmp.lt.s32.totalorder %v958_v8, 92  ;;  %vm330_vm8 = vcmp.lt.s32.totalorder %v958_v8, 90  ;;  %s186_s29 = scalar_lea.vmem [#allocation6], %s651_s26  ;;  %p1045_p11 = scmp.ne.s32.totalorder %s1040_s23, 0 }
  0x3e   : > { %s532_s5 = sshll.u32 %s186_s29, 4  ;;  %s992_s5 = int_to_ptr.vmem [resolvable:$true] %s532_s5 }
  0x40   : > { %234 = vrot.lane.b32.xlu1 %v190_v2, %s812_s30  ;;  %197 = vrot.lane.b32.xlu0 %v190_v2, %s813_s4  ;;  %s990_s4 = scalar_lea.hbm %s1037_s3, %s652_s27 }
  0x44   : > { %223 = vrot.lane.b32.xlu1 %v188_v0, %s814_s6  ;;  %221 = vrot.lane.b32.xlu0 %v190_v2, %s814_s6 }
  0x48   : > { %269 = vrot.lane.b32.xlu1 %v190_v2, %s816_s22  ;;  %219 = vrot.lane.b32.xlu0 %v187_v1, %s814_s6  ;;  %s743_s6 = scalar_lea.vmem %s992_s5, 384 }
  0x49   : > { %p744_p6 = scmp.ne.s32.totalorder %s992_s5, %s743_s6 }
  0x4b   : > { %p745_p12 = pnand %p744_p6, %p1045_p11 }
  0x4c   : > { %304 = vrot.lane.b32.xlu1 %v190_v2, %s817_s7  ;;  %271 = vrot.lane.b32.xlu0 %v188_v0, %s816_s22 }
  0x4d   : > { %p746_p13 = pneg %p745_p12 }
  0x50   : > { %267 = vrot.lane.b32.xlu1 %v187_v1, %s816_s22  ;;  %306 = vrot.lane.b32.xlu0 %v188_v0, %s817_s7  ;;  %s824_s22 = smov [#allocation6]  }
  0x54   : > { %256 = vrot.lane.b32.xlu1 %v190_v2, %s818_s9  ;;  %302 = vrot.lane.b32.xlu0 %v187_v1, %s817_s7  ;;  %s747_s7 = sshll.u32 %s824_s22, 4  ;;  %s748_s7 = int_to_ptr.vmem [resolvable:$false] %s747_s7 }
  0x55   : > { %p750_p5 = scmp.lt.s32.totalorder %s992_s5, %s748_s7 }
  0x58   : > { %291 = vrot.lane.b32.xlu1 %v190_v2, %s819_s10  ;;  %258 = vrot.lane.b32.xlu0 %v188_v0, %s818_s9 }
  0x5c   : > { %254 = vrot.lane.b32.xlu1 %v187_v1, %s818_s9  ;;  %293 = vrot.lane.b32.xlu0 %v188_v0, %s819_s10  ;;  %s749_s9 = scalar_lea.vmem %s748_s7, 768 }
  0x5d   : > { %p751_p10 = scmp.lt.s32.totalorder %s749_s9, %s743_s6 }
  0x5f   : > { %p752_p2 = por %p751_p10, %p750_p5 }
  0x60   : > { %326 = vrot.lane.b32.xlu1 %v190_v2, %s820_s11  ;;  %289 = vrot.lane.b32.xlu0 %v187_v1, %s819_s10 }
  0x61   : > { %p753_p4 = pnand %p752_p2, %p746_p13 }
  0x64   : > { %324 = vrot.lane.b32.xlu1 %v187_v1, %s820_s11  ;;  %328 = vrot.lane.b32.xlu0 %v188_v0, %s820_s11 }
  0x68   : > { %356 = vperm.xlu0 %711, %v353_v6  }
  0xaa   : > { %v237_v9 = vpop.permute.xlu1 %236  ;;  %v200_v10 = vpop.permute.xlu0 %199 }
  0xae   : > { %v233_v11 = vpop.permute.xlu1 %232  ;;  %v196_v12 = vpop.permute.xlu0 %195 }
  0xaf   : > { %v241_v13 = vsel %vm238_vm1, %v237_v9, %v233_v11  ;;  %v206_v14 = vsel %vm203_vm2, %v200_v10, %v196_v12 }
  0xb0   : > { %v247_v15 = vrot.slane %v241_v13, 4  ;;  %v212_v16 = vrot.slane %v206_v14, 4 }
  0xb2   : > { %253 = vst [vmem:[#allocation2 + $0x28] sm:$0xf0] %v247_v15  ;;  %218 = vst [vmem:[#allocation2 + $0x10] sm:$0xf0] %v212_v16  ;;  %v235_v17 = vpop.permute.xlu1 %234  ;;  %v198_v18 = vpop.permute.xlu0 %197 }
  0xb3   : > { %v239_v19 = vsel %vm238_vm1, %v235_v17, %v237_v9  ;;  %v240_v20 = vsel %vm238_vm1, %v233_v11, %v235_v17  ;;  %v204_v21 = vsel %vm203_vm2, %v198_v18, %v200_v10  ;;  %v205_v22 = vsel %vm203_vm2, %v196_v12, %v198_v18 }
  0xb4   : > { %v245_v23 = vrot.slane %v240_v20, 4  ;;  %v246_v24 = vrot.slane %v239_v19, 4  ;;  %v210_v25 = vrot.slane %v205_v22, 4  ;;  %v211_v26 = vrot.slane %v204_v21, 4 }
  0xb6   : > { %251 = vst [vmem:[#allocation2 + $0x18] sm:$0xf0] %v245_v23  ;;  %252 = vst [vmem:[#allocation2 + $0x20] sm:$0xf0] %v246_v24  ;;  %v224_v27 = vpop.permute.xlu1 %223  ;;  %v222_v28 = vpop.permute.xlu0 %221 }
  0xb7   : > { %216 = vst [vmem:[#allocation2] sm:$0xf0] %v210_v25  ;;  %217 = vst [vmem:[#allocation2 + $0x8] sm:$0xf0] %v211_v26  ;;  %v226_v29 = vsel %vm225_vm3, %v222_v28, %v224_v27  ;;  %v337_v26 = vld [vmem:[%s1035_s1] sm:$0xff] }
  0xb8   : > { %230 = vst [vmem:[#allocation2 + $0x20] sm:$0xf] %v226_v29 }
  0xb9   : > { %v340_v46 = vld [vmem:[#allocation2 + $0x10] sm:$0xff] }
  0xba   : > { %v270_v30 = vpop.permute.xlu1 %269  ;;  %v220_v31 = vpop.permute.xlu0 %219 }
  0xbb   : > { %v227_v32 = vsel %vm225_vm3, %v220_v31, %v222_v28  ;;  %v228_v33 = vsel %vm225_vm3, %v224_v27, %v220_v31 }
  0xbc   : > { %229 = vst [vmem:[#allocation2 + $0x18] sm:$0xf] %v227_v32  ;;  %231 = vst [vmem:[#allocation2 + $0x28] sm:$0xf] %v228_v33 }
  0xbe   : > { %v305_v34 = vpop.permute.xlu1 %304  ;;  %v272_v35 = vpop.permute.xlu0 %271  ;;  %v339_v37 = vld [vmem:[#allocation2 + $0x8] sm:$0xff]  ;;  %v338_v53 = vld [vmem:[#allocation2] sm:$0xff] }
  0xbf   : > { %v274_v36 = vsel %vm273_vm4, %v270_v30, %v272_v35  ;;  %v342_v38 = vld [vmem:[#allocation2 + $0x20] sm:$0xff] }
  0xc0   : > { %v281_v39 = vrot.slane %v274_v36, 4  ;;  %v634_v40 = vpack.c.bf16 %v342_v38, %v339_v37 }
  0xc2   : > { %287 = vst [vmem:[#allocation2 + $0x38] sm:$0xf0] %v281_v39  ;;  %v268_v41 = vpop.permute.xlu1 %267  ;;  %v307_v42 = vpop.permute.xlu0 %306  ;;  %635 = vmatprep.subr.bf16.mxu0 %v634_v40 }
  0xc3   : > { %v275_v43 = vsel %vm273_vm4, %v268_v41, %v270_v30  ;;  %v276_v44 = vsel %vm273_vm4, %v272_v35, %v268_v41  ;;  %v309_v45 = vsel %vm308_vm5, %v305_v34, %v307_v42  ;;  %v343_v47 = vld [vmem:[#allocation2 + $0x28] sm:$0xff]  ;;  %v341_v48 = vld [vmem:[#allocation2 + $0x18] sm:$0xff] }
  0xc4   : > { %v280_v49 = vrot.slane %v275_v43, 4  ;;  %v282_v50 = vrot.slane %v276_v44, 4  ;;  %v316_v51 = vrot.slane %v309_v45, 4  ;;  %v643_v52 = vpack.c.bf16 %v343_v47, %v340_v46 }
  0xc5   : > { %v636_v54 = vpack.c.bf16 %v341_v48, %v338_v53 }
  0xc6   : > { %286 = vst [vmem:[#allocation2 + $0x30] sm:$0xf0] %v280_v49  ;;  %288 = vst [vmem:[#allocation2 + $0x40] sm:$0xf0] %v282_v50  ;;  %v257_v55 = vpop.permute.xlu1 %256  ;;  %644 = vmatpush3.bf16.msra.mxu1 %v643_v52  ;;  %v303_v56 = vpop.permute.xlu0 %302 }
  0xc7   : > { %322 = vst [vmem:[#allocation2 + $0x50] sm:$0xf0] %v316_v51  ;;  %v310_v57 = vsel %vm308_vm5, %v303_v56, %v305_v34  ;;  %v311_v58 = vsel %vm308_vm5, %v307_v42, %v303_v56  ;;  %637 = vmatpush1.bf16.msra.mxu0 %v636_v54  ;;  %645 = vmatprep.subr.bf16.mxu1 %v815_v3 }
  0xc8   : > { %v315_v59 = vrot.slane %v310_v57, 4  ;;  %v317_v60 = vrot.slane %v311_v58, 4 }
  0xca   : > { %321 = vst [vmem:[#allocation2 + $0x48] sm:$0xf0] %v315_v59  ;;  %323 = vst [vmem:[#allocation2 + $0x58] sm:$0xf0] %v317_v60  ;;  %v292_v61 = vpop.permute.xlu1 %291  ;;  %v259_v62 = vpop.permute.xlu0 %258 }
  0xcb   : > { %v261_v63 = vsel %vm260_vm6, %v257_v55, %v259_v62 }
  0xcc   : > { %265 = vst [vmem:[#allocation2 + $0x38] sm:$0xf] %v261_v63 }
  0xce   : > { %v255_v0 = vpop.permute.xlu1 %254  ;;  %v294_v1 = vpop.permute.xlu0 %293 }
  0xcf   : > { %v262_v2 = vsel %vm260_vm6, %v255_v0, %v257_v55  ;;  %v263_v5 = vsel %vm260_vm6, %v259_v62, %v255_v0  ;;  %v296_v6 = vsel %vm295_vm7, %v292_v61, %v294_v1 }
  0xd0   : > { %264 = vst [vmem:[#allocation2 + $0x30] sm:$0xf] %v262_v2  ;;  %266 = vst [vmem:[#allocation2 + $0x40] sm:$0xf] %v263_v5 }
  0xd1   : > { %300 = vst [vmem:[#allocation2 + $0x50] sm:$0xf] %v296_v6 }
  0xd2   : > { %v327_v3 = vpop.permute.xlu1 %326  ;;  %v290_v7 = vpop.permute.xlu0 %289 }
  0xd3   : > { %v297_v9 = vsel %vm295_vm7, %v290_v7, %v292_v61  ;;  %v298_v10 = vsel %vm295_vm7, %v294_v1, %v290_v7  ;;  %v345_v16 = vld [vmem:[#allocation2 + $0x38] sm:$0xff] }
  0xd4   : > { %299 = vst [vmem:[#allocation2 + $0x48] sm:$0xf] %v297_v9  ;;  %301 = vst [vmem:[#allocation2 + $0x58] sm:$0xf] %v298_v10 }
  0xd6   : > { %v325_v11 = vpop.permute.xlu1 %324  ;;  %v329_v12 = vpop.permute.xlu0 %328 }
  0xd7   : > { %v332_v13 = vsel %vm330_vm8, %v325_v11, %v327_v3  ;;  %v331_v14 = vsel %vm330_vm8, %v327_v3, %v329_v12  ;;  %v333_v15 = vsel %vm330_vm8, %v329_v12, %v325_v11  ;;  %v344_v19 = vld [vmem:[#allocation2 + $0x30] sm:$0xff]  ;;  %v346_v21 = vld [vmem:[#allocation2 + $0x40] sm:$0xff] }
  0xd8   : > { %v348_v17 = vld [vmem:[#allocation2 + $0x50] sm:$0xff]  ;;  %334 = vst [vmem:[#allocation2 + $0x60] sm:$0xf] %v332_v13  ;;  %335 = vst [vmem:[#allocation2 + $0x68] sm:$0xf] %v331_v14 }
  0xd9   : > { %336 = vst [vmem:[#allocation2 + $0x70] sm:$0xf] %v333_v15  ;;  %v638_v18 = vpack.c.bf16 %v348_v17, %v345_v16 }
  0xdb   : > { %639 = vmatprep.subr.bf16.mxu0 %v638_v18  ;;  %v347_v20 = vld [vmem:[#allocation2 + $0x48] sm:$0xff]  ;;  %v349_v22 = vld [vmem:[#allocation2 + $0x58] sm:$0xff] }
  0xdc   : > { %v640_v23 = vpack.c.bf16 %v347_v20, %v344_v19  ;;  %v646_v24 = vpack.c.bf16 %v349_v22, %v346_v21 }
  0xde   : > { %641 = vmatpush1.bf16.msra.mxu0 %v640_v23  ;;  %647 = vmatpush3.bf16.msra.mxu1 %v646_v24 }
  0xdf   : > { %v351_v8 = vld [vmem:[#allocation2 + $0x68] sm:$0xf]  ;;  %629 = vmatprep.subr.mxu1 %v821_v4  ;;  %v350_v27 = vld [vmem:[#allocation2 + $0x60] sm:$0xf] }
  0xe0   : > { %v352_v25 = vld [vmem:[#allocation2 + $0x70] sm:$0xf]  ;;  %607 = vmatprep.subr.msk.mxu0 %vm363_vm9, %v351_v8 }
  0xe2   : > { %608 = vmatpush1.msk.msra.mxu0 %vm363_vm9, %v350_v27  ;;  %630 = vmatpush3.msk.msra.mxu1 %vm363_vm9, %v352_v25 }
  0xe3   : > { %609 = vmatmul.mubr.msk.f32.vlgmr.msra.gmra.mrb[0].mxu0 %vm359_vm10, %v337_v26  ;;  %632 = vmatmul.mubr.msk.f32.vlgmr.msra.gmra.mrb[0].mxu1 %vm359_vm10, %v337_v26 }
  0xe7   : > { %v357_v28 = vpop.permute.xlu0 %356 }
 0x1b6   : > { %v510_v4 = vpop.f32.mrb[0].mxu1  ;;  %v439_v29 = vpop.f32.mrb[0].mxu0 }
 0x1b7   : > { %v511_v30 = vadd.f32 %v510_v4, %v357_v28  ;;  %v440_v31 = vadd.f32 %v439_v29, %v357_v28  ;;  %v441_v32 = vpop.f32.mrb[1].mxu0  ;;  %v633_v33 = vpop.f32.mrb[1].mxu1 }
 0x1b8   : > { %v442_v34 = vadd.f32 %v441_v32, %v357_v28 }
 0x1b9   : > { %516 = vst [vmem:[%s186_s29 + $0x10] sm:$0xff] %v511_v30  ;;  %514 = vst [vmem:[%s186_s29] sm:$0xff] %v440_v31 }
 0x1ba   : > { %515 = vst [vmem:[%s186_s29 + $0x8] sm:$0xff] %v442_v34 }
 0x1bb   : > { %756 = shalt.err (!%p753_p4)
}
 0x1bc   : > { %s757_s28 = scalar_lea.hbm %s990_s4, 384  ;;  %s761_s17 = scalar_lea.hbm %s1037_s3, 768 }
 0x1bd   : > { %p758_p7 = scmp.ne.s32.totalorder %s990_s4, %s757_s28  ;;  %p762_p0 = scmp.lt.u32.totalorder %s990_s4, %s1037_s3 }
 0x1be   : > { %p763_p1 = scmp.lt.u32.totalorder %s761_s17, %s757_s28  ;;  %p765_p6 = scmp.lt.u32.totalorder %s757_s28, %s990_s4 }
 0x1bf   : > { %p759_p8 = pnand %p758_p7, %p1045_p11 }
 0x1c0   : > { %p764_p3 = por %p763_p1, %p762_p0 }
 0x1c1   : > { %p760_p9 = pneg %p759_p8 }
 0x1c2   : > { %p766_p12 = por %p765_p6, %p764_p3 }
 0x1c4   : > { %p767_p13 = pnand %p766_p12, %p760_p9 }
 0x1c6   : > { %770 = shalt.err (!%p767_p13)
}
 0x1c7   : > { %655 = dma.vmem_to_hbm [thread:$0]  (%p1045_p11), %s992_s5, 384, %s990_s4, %s518_s16  }
 0x1c8 PF: > { %s544_s25 = sand.u32 1, %s797_s12   ;;  %p1046_p5 = scmp.ne.s32.totalorder %s1041_s24, 0 }
 0x1c9   : > { %p1047_p10 = scmp.ge.s32.totalorder %s809_s15, 2  ;;  %s545_s26 = scalar_lea.sflag [#allocation5], %s544_s25 }
 0x1cb   : > { %p662_p2 = pnand %p1047_p10, %p1046_p5 }
 0x1cd   : > { %792 = dma.done.wait (!%p662_p2), %s545_s26, 384  }
 0x1ce   : > { %794 = vsyncadd (!%p662_p2), %s545_s26, 4294966912  ;;  %p16_p4 = scmp.ge.s32.totalorder %s870_s18, 4   ;;  %s1048_s12 = smov %s801_s13 }
 0x1cf   : > { %s1049_s13 = smov %s805_s14  ;;  %s1050_s14 = smov %s882_s21 }
 0x1d0   : > { %s1051_s15 = smov %s870_s18  ;;  %18 = sbr.rel (!%p16_p4) target bundleno = 5 (0x5), region = 77 }
 0x1d7   :  { %550 = vsyncpa [#allocation4], 1 }
 0x1d8   :  { %552 = vsyncpa [#allocation4 + $0x1], 1 }
 0x1d9   :  { %553 = vsyncpa [#allocation5], 1 }
 0x1da   :  { %555 = vsyncpa [#allocation5 + $0x1], 1 }

</bundles_post_ra>
